<compile_context>
chip_gen: v5e
topology: v5e:2x2
jax: 0.10.0
libtpu: 0.0.40
codegen_flags: <defaults>
</compile_context>

<pallas_src>
import jax
import jax.numpy as jnp
from jax.experimental import pallas as pl
from jax.experimental.pallas import tpu as pltpu


_MAX_TILE_B = 256   # rows per grid step once the batch gets large


def _relu(x):
    return jnp.maximum(x, 0.0)


def _build_soft_q_kernel(n_cat, dims, vocabs, n_num, n_act, tile_b, activation):
    """Fused kernel: embedding row-gather + linear1/act + linear2/act + linear3."""
    n_in = 2 * n_cat + 9  # tables, W1 pieces, num, W1_num, act, W1_act, b1, W2, b2, W3, b3

    def kernel(idx_ref, *args):
        in_refs = args[:n_in]
        out_ref = args[n_in]
        emb_refs = args[n_in + 1:]           # one (tile_b, D_c) VMEM scratch per column

        pos = 0
        table_refs = in_refs[pos:pos + n_cat]; pos += n_cat
        w1e_refs = in_refs[pos:pos + n_cat]; pos += n_cat
        (num_ref, w1n_ref, act_ref, w1a_ref,
         b1_ref, w2_ref, b2_ref, w3_ref, b3_ref) = in_refs[pos:]

        row_base = pl.program_id(0) * tile_b

        # --- embedding gather: scalar indices from SMEM, dynamic-row reads ----
        @pl.loop(0, tile_b)
        def _(b):
            flat = (row_base + b) * n_cat
            for c in range(n_cat):
                idx = idx_ref[flat + c]
                idx = jnp.clip(idx, 0, vocabs[c] - 1)   # torch would raise on OOB
                emb_refs[c][pl.ds(b, 1), :] = table_refs[c][pl.ds(idx, 1), :]

        # --- linear1 (torch.cat folded into per-piece matmuls) + activation ---
        h = jnp.dot(num_ref[...], w1n_ref[...], preferred_element_type=jnp.float32)
        h = h + jnp.dot(act_ref[...], w1a_ref[...], preferred_element_type=jnp.float32)
        for c in range(n_cat):
            h = h + jnp.dot(emb_refs[c][...], w1e_refs[c][...],
                            preferred_element_type=jnp.float32)
        h = activation(h + b1_ref[...])

        # --- linear2 + activation, linear3 ------------------------------------
        h = activation(jnp.dot(h, w2_ref[...], preferred_element_type=jnp.float32)
                       + b2_ref[...])
        q = jnp.dot(h, w3_ref[...], preferred_element_type=jnp.float32) + b3_ref[...]
        out_ref[...] = q.astype(out_ref.dtype)

    return kernel


class EmbeddingLayer:
    """JAX port of the PyTorch EmbeddingLayer (per-column nn.Embedding)."""

    def __init__(self, cat_code_dict, cat_cols, key):
        self.cat_code_dict = cat_code_dict
        self.cat_cols = list(cat_cols)
        self.tables = []
        self.dims = []
        for col in self.cat_cols:
            vocab = len(cat_code_dict[col])
            dim = min(50, vocab // 2)
            assert dim >= 1, f"column {col}: vocab={vocab} gives embedding dim 0"
            key, sub = jax.random.split(key)
            # nn.Embedding default init: N(0, 1)
            self.tables.append(jax.random.normal(sub, (vocab, dim), dtype=jnp.float32))
            self.dims.append(dim)
        self.total_dim = sum(self.dims)


class SoftQNetwork:
    """JAX/Pallas port of the PyTorch SoftQNetwork (fused forward kernel)."""

    def __init__(self, num_inputs, num_actions, hidden_size, embedding_layer,
                 activation=_relu, init_w=0.003, key=None):
        if key is None:
            key = jax.random.PRNGKey(0)
        self.embedding_layer = embedding_layer
        self.num_actions = num_actions
        self.hidden_size = hidden_size
        self.activation = activation

        fan1 = num_inputs + num_actions
        k1, k2, k3, k4, k5, k6 = jax.random.split(key, 6)
        bnd1 = 1.0 / (fan1 ** 0.5)
        self.W1 = jax.random.uniform(k1, (fan1, hidden_size), jnp.float32, -bnd1, bnd1)
        self.b1 = jax.random.uniform(k2, (1, hidden_size), jnp.float32, -bnd1, bnd1)
        bnd2 = 1.0 / (hidden_size ** 0.5)
        self.W2 = jax.random.uniform(k3, (hidden_size, hidden_size), jnp.float32, -bnd2, bnd2)
        self.b2 = jax.random.uniform(k4, (1, hidden_size), jnp.float32, -bnd2, bnd2)
        self.W3 = jax.random.uniform(k5, (hidden_size, 1), jnp.float32, -init_w, init_w)
        self.b3 = jax.random.uniform(k6, (1, 1), jnp.float32, -init_w, init_w)

    def forward(self, state, action):
        emb = self.embedding_layer
        n_cat = len(emb.cat_cols)
        dims = emb.dims
        vocabs = [t.shape[0] for t in emb.tables]
        emb_total = emb.total_dim

        B = state.shape[0]
        n_num = state.shape[1] - n_cat
        n_act = action.shape[1]
        assert n_num >= 1 and n_act >= 1
        assert emb_total + n_num + n_act == self.W1.shape[0]

        cat = state[:, :n_cat].astype(jnp.int32)
        num = state[:, n_cat:].astype(jnp.float32)
        act = action.astype(jnp.float32)

        # ---- batch tiling: one big tile if small, else 256-row grid steps ----
        if B <= _MAX_TILE_B:
            tile_b, b_pad = B, B
        else:
            tile_b = _MAX_TILE_B
            b_pad = ((B + tile_b - 1) // tile_b) * tile_b
        if b_pad != B:
            pad = b_pad - B
            cat = jnp.pad(cat, ((0, pad), (0, 0)))
            num = jnp.pad(num, ((0, pad), (0, 0)))
            act = jnp.pad(act, ((0, pad), (0, 0)))
        grid = (b_pad // tile_b,)

        # ---- split W1 rows per concat piece at trace time (layout plumbing) --
        w1_pieces = []
        off = 0
        for d in dims:
            w1_pieces.append(self.W1[off:off + d, :])
            off += d
        w1_num = self.W1[off:off + n_num, :]
        off += n_num
        w1_act = self.W1[off:off + n_act, :]

        cat_flat = cat.reshape(-1)   # (b_pad * n_cat,) int32, row-major -> SMEM

        kernel = _build_soft_q_kernel(n_cat, dims, vocabs, n_num, n_act, tile_b,
                                      self.activation)

        full = lambda i, idx: (0, 0)   # index_maps receive the prefetch ref too
        row = lambda i, idx: (i, 0)

        in_specs = (
            [pl.BlockSpec(t.shape, full) for t in emb.tables]      # embedding tables
            + [pl.BlockSpec(w.shape, full) for w in w1_pieces]     # per-column W1 pieces
            + [pl.BlockSpec((tile_b, n_num), row),                 # numeric features
               pl.BlockSpec(w1_num.shape, full),
               pl.BlockSpec((tile_b, n_act), row),                 # actions
               pl.BlockSpec(w1_act.shape, full),
               pl.BlockSpec(self.b1.shape, full),
               pl.BlockSpec(self.W2.shape, full),
               pl.BlockSpec(self.b2.shape, full),
               pl.BlockSpec(self.W3.shape, full),
               pl.BlockSpec(self.b3.shape, full)]
        )
        out_specs = pl.BlockSpec((tile_b, 1), row)
        scratch_shapes = [pltpu.VMEM((tile_b, d), jnp.float32) for d in dims]

        out = pl.pallas_call(
            kernel,
            out_shape=jax.ShapeDtypeStruct((b_pad, 1), jnp.float32),
            grid_spec=pltpu.PrefetchScalarGridSpec(
                num_scalar_prefetch=1,
                grid=grid,
                in_specs=in_specs,
                out_specs=out_specs,
                scratch_shapes=scratch_shapes),
            compiler_params=pltpu.CompilerParams(
                dimension_semantics=("parallel",)),
        )(cat_flat, *emb.tables, *w1_pieces, num, w1_num, act, w1_act,
          self.b1, self.W2, self.b2, self.W3, self.b3)

        return out[:B]

    __call__ = forward


if __name__ == "__main__":
    key = jax.random.PRNGKey(0)

    # Small synthetic categorical schema.
    cat_code_dict = {
        "colA": list(range(10)),   # vocab 10 -> dim 5
        "colB": list(range(20)),   # vocab 20 -> dim 10
        "colC": list(range(30)),   # vocab 30 -> dim 15
    }
    cat_cols = ["colA", "colB", "colC"]

    key, k_emb, k_net, k_state, k_act = jax.random.split(key, 5)
    emb_layer = EmbeddingLayer(cat_code_dict, cat_cols, k_emb)

    n_num = 6
    n_act = 3
    hidden = 32
    num_inputs = emb_layer.total_dim + n_num    # post-embedding state feature size
    net = SoftQNetwork(num_inputs, n_act, hidden, emb_layer, key=k_net)

    B = 8
    ks = jax.random.split(k_state, len(cat_cols) + 1)
    idx_cols = []
    for i, col in enumerate(cat_cols):
        vocab = len(cat_code_dict[col])
        idx_cols.append(jax.random.randint(ks[i], (B,), 0, vocab, dtype=jnp.int32))
    num_feat = jax.random.normal(ks[-1], (B, n_num), dtype=jnp.float32)
    # state = [categorical codes (stored as floats) | numeric features]
    state = jnp.concatenate(
        [jnp.stack(idx_cols, axis=1).astype(jnp.float32), num_feat], axis=1)
    action = jax.random.normal(k_act, (B, n_act), dtype=jnp.float32)

    q = net.forward(state, action)
    q = jax.block_until_ready(q)

    # ---- pure-JAX reference --------------------------------------------------
    cat = state[:, :len(cat_cols)].astype(jnp.int32)
    num = state[:, len(cat_cols):]
    embs = [jnp.take(emb_layer.tables[c], cat[:, c], axis=0)
            for c in range(len(cat_cols))]
    x = jnp.concatenate(embs + [num, action], axis=1)
    h = jnp.maximum(x @ net.W1 + net.b1, 0.0)
    h = jnp.maximum(h @ net.W2 + net.b2, 0.0)
    ref = h @ net.W3 + net.b3

    assert q.shape == (B, 1)
    err = jnp.max(jnp.abs(q - ref))
    assert jnp.allclose(q, ref, atol=1e-4, rtol=1e-4), f"mismatch, max err={err}"

    print("KERNEL_OK")
</pallas_src>

<mosaic_0001>
module attributes {stable_mosaic.version = 11 : i64} {
  func.func @kernel(%arg0: i32, %arg1: memref<24xi32, #tpu.memory_space<smem>>, %arg2: memref<10x5xf32, #tpu.memory_space<vmem>>, %arg3: memref<20x10xf32, #tpu.memory_space<vmem>>, %arg4: memref<30x15xf32, #tpu.memory_space<vmem>>, %arg5: memref<5x32xf32, #tpu.memory_space<vmem>>, %arg6: memref<10x32xf32, #tpu.memory_space<vmem>>, %arg7: memref<15x32xf32, #tpu.memory_space<vmem>>, %arg8: memref<8x6xf32, #tpu.memory_space<vmem>>, %arg9: memref<6x32xf32, #tpu.memory_space<vmem>>, %arg10: memref<8x3xf32, #tpu.memory_space<vmem>>, %arg11: memref<3x32xf32, #tpu.memory_space<vmem>>, %arg12: memref<1x32xf32, #tpu.memory_space<vmem>>, %arg13: memref<32x32xf32, #tpu.memory_space<vmem>>, %arg14: memref<1x32xf32, #tpu.memory_space<vmem>>, %arg15: memref<32x1xf32, #tpu.memory_space<vmem>>, %arg16: memref<1x1xf32, #tpu.memory_space<vmem>>, %arg17: memref<8x1xf32, #tpu.memory_space<vmem>>, %arg18: memref<8x5xf32, #tpu.memory_space<vmem>>, %arg19: memref<8x10xf32, #tpu.memory_space<vmem>>, %arg20: memref<8x15xf32, #tpu.memory_space<vmem>>) attributes {dimension_semantics = [#tpu.dimension_semantics<parallel>], iteration_bounds = array<i64: 1>, scalar_prefetch = 1 : i64, scratch_operands = 3 : i64, tpu.core_type = #tpu.core_type<tc>, window_params = [{pipeline_mode = #tpu.pipeline_mode<synchronous>, transform_indices = @transform_0, window_bounds = array<i64: 10, 5>}, {pipeline_mode = #tpu.pipeline_mode<synchronous>, transform_indices = @transform_1, window_bounds = array<i64: 20, 10>}, {pipeline_mode = #tpu.pipeline_mode<synchronous>, transform_indices = @transform_2, window_bounds = array<i64: 30, 15>}, {pipeline_mode = #tpu.pipeline_mode<synchronous>, transform_indices = @transform_3, window_bounds = array<i64: 5, 32>}, {pipeline_mode = #tpu.pipeline_mode<synchronous>, transform_indices = @transform_4, window_bounds = array<i64: 10, 32>}, {pipeline_mode = #tpu.pipeline_mode<synchronous>, transform_indices = @transform_5, window_bounds = array<i64: 15, 32>}, {transform_indices = @transform_6, window_bounds = array<i64: 8, 6>}, {pipeline_mode = #tpu.pipeline_mode<synchronous>, transform_indices = @transform_7, window_bounds = array<i64: 6, 32>}, {transform_indices = @transform_8, window_bounds = array<i64: 8, 3>}, {pipeline_mode = #tpu.pipeline_mode<synchronous>, transform_indices = @transform_9, window_bounds = array<i64: 3, 32>}, {pipeline_mode = #tpu.pipeline_mode<synchronous>, transform_indices = @transform_10, window_bounds = array<i64: 1, 32>}, {pipeline_mode = #tpu.pipeline_mode<synchronous>, transform_indices = @transform_11, window_bounds = array<i64: 32, 32>}, {pipeline_mode = #tpu.pipeline_mode<synchronous>, transform_indices = @transform_12, window_bounds = array<i64: 1, 32>}, {pipeline_mode = #tpu.pipeline_mode<synchronous>, transform_indices = @transform_13, window_bounds = array<i64: 32, 1>}, {pipeline_mode = #tpu.pipeline_mode<synchronous>, transform_indices = @transform_14, window_bounds = array<i64: 1, 1>}, {transform_indices = @transform_15, window_bounds = array<i64: 8, 1>}]} {
    %c8_i32 = arith.constant 8 : i32
    %0 = arith.muli %arg0, %c8_i32 : i32
    %c0_i32 = arith.constant 0 : i32
    %c8_i32_0 = arith.constant 8 : i32
    %1 = arith.addi %c0_i32, %c8_i32_0 : i32
    %c1_i32 = arith.constant 1 : i32
    scf.for %arg21 = %c0_i32 to %1 step %c1_i32  : i32 {
      %c1_i32_41 = arith.constant 1 : i32
      %39 = arith.muli %arg21, %c1_i32_41 : i32
      %c0_i32_42 = arith.constant 0 : i32
      %40 = arith.addi %c0_i32_42, %39 : i32
      %41 = arith.addi %0, %40 : i32
      %c3_i32 = arith.constant 3 : i32
      %42 = arith.muli %41, %c3_i32 : i32
      %c0_i32_43 = arith.constant 0 : i32
      %43 = arith.addi %42, %c0_i32_43 : i32
      %44 = arith.index_cast %43 : i32 to index
      %45 = memref.load %arg1[%44] : memref<24xi32, #tpu.memory_space<smem>>
      %c0_i32_44 = arith.constant 0 : i32
      %c9_i32 = arith.constant 9 : i32
      %46 = arith.maxsi %c0_i32_44, %45 : i32
      %47 = arith.minsi %c9_i32, %46 : i32
      %48 = arith.index_cast %47 : i32 to index
      %c0_45 = arith.constant 0 : index
      %49 = vector.load %arg2[%48, %c0_45] : memref<10x5xf32, #tpu.memory_space<vmem>>, vector<1x5xf32>
      %50 = arith.index_cast %40 : i32 to index
      %c0_46 = arith.constant 0 : index
      %51 = vector.load %arg18[%50, %c0_46] : memref<8x5xf32, #tpu.memory_space<vmem>>, vector<1x5xf32>
      tpu.vector_store %arg18[%50, %c0_46], %49 {strides = array<i32>} : memref<8x5xf32, #tpu.memory_space<vmem>>, vector<1x5xf32>,
      %c1_i32_47 = arith.constant 1 : i32
      %52 = arith.addi %42, %c1_i32_47 : i32
      %53 = arith.index_cast %52 : i32 to index
      %54 = memref.load %arg1[%53] : memref<24xi32, #tpu.memory_space<smem>>
      %c0_i32_48 = arith.constant 0 : i32
      %c19_i32 = arith.constant 19 : i32
      %55 = arith.maxsi %c0_i32_48, %54 : i32
      %56 = arith.minsi %c19_i32, %55 : i32
      %57 = arith.index_cast %56 : i32 to index
      %c0_49 = arith.constant 0 : index
      %58 = vector.load %arg3[%57, %c0_49] : memref<20x10xf32, #tpu.memory_space<vmem>>, vector<1x10xf32>
      %59 = arith.index_cast %40 : i32 to index
      %c0_50 = arith.constant 0 : index
      %60 = vector.load %arg19[%59, %c0_50] : memref<8x10xf32, #tpu.memory_space<vmem>>, vector<1x10xf32>
      tpu.vector_store %arg19[%59, %c0_50], %58 {strides = array<i32>} : memref<8x10xf32, #tpu.memory_space<vmem>>, vector<1x10xf32>,
      %c2_i32 = arith.constant 2 : i32
      %61 = arith.addi %42, %c2_i32 : i32
      %62 = arith.index_cast %61 : i32 to index
      %63 = memref.load %arg1[%62] : memref<24xi32, #tpu.memory_space<smem>>
      %c0_i32_51 = arith.constant 0 : i32
      %c29_i32 = arith.constant 29 : i32
      %64 = arith.maxsi %c0_i32_51, %63 : i32
      %65 = arith.minsi %c29_i32, %64 : i32
      %66 = arith.index_cast %65 : i32 to index
      %c0_52 = arith.constant 0 : index
      %67 = vector.load %arg4[%66, %c0_52] : memref<30x15xf32, #tpu.memory_space<vmem>>, vector<1x15xf32>
      %68 = arith.index_cast %40 : i32 to index
      %c0_53 = arith.constant 0 : index
      %69 = vector.load %arg20[%68, %c0_53] : memref<8x15xf32, #tpu.memory_space<vmem>>, vector<1x15xf32>
      tpu.vector_store %arg20[%68, %c0_53], %67 {strides = array<i32>} : memref<8x15xf32, #tpu.memory_space<vmem>>, vector<1x15xf32>,
    }
    %c8_i32_1 = arith.constant 8 : i32
    %c0 = arith.constant 0 : index
    %c0_2 = arith.constant 0 : index
    %2 = vector.load %arg8[%c0, %c0_2] : memref<8x6xf32, #tpu.memory_space<vmem>>, vector<8x6xf32>
    %c0_3 = arith.constant 0 : index
    %c0_4 = arith.constant 0 : index
    %3 = vector.load %arg9[%c0_3, %c0_4] : memref<6x32xf32, #tpu.memory_space<vmem>>, vector<6x32xf32>
    %cst = arith.constant dense<0.000000e+00> : vector<8x32xf32>
    %4 = tpu.matmul %2, %3, %cst {dimension_numbers = #tpu.dot_dimension_numbers<[1], [0], [0], [1], [0, 0, 1, 1], [], []>} : vector<8x6xf32>, vector<6x32xf32>, vector<8x32xf32> -> vector<8x32xf32>
    %c0_5 = arith.constant 0 : index
    %c0_6 = arith.constant 0 : index
    %5 = vector.load %arg10[%c0_5, %c0_6] : memref<8x3xf32, #tpu.memory_space<vmem>>, vector<8x3xf32>
    %c0_7 = arith.constant 0 : index
    %c0_8 = arith.constant 0 : index
    %6 = vector.load %arg11[%c0_7, %c0_8] : memref<3x32xf32, #tpu.memory_space<vmem>>, vector<3x32xf32>
    %cst_9 = arith.constant dense<0.000000e+00> : vector<8x32xf32>
    %7 = tpu.matmul %5, %6, %cst_9 {dimension_numbers = #tpu.dot_dimension_numbers<[1], [0], [0], [1], [0, 0, 1, 1], [], []>} : vector<8x3xf32>, vector<3x32xf32>, vector<8x32xf32> -> vector<8x32xf32>
    %8 = arith.addf %4, %7 : vector<8x32xf32>
    %c0_10 = arith.constant 0 : index
    %c0_11 = arith.constant 0 : index
    %9 = vector.load %arg18[%c0_10, %c0_11] : memref<8x5xf32, #tpu.memory_space<vmem>>, vector<8x5xf32>
    %c0_12 = arith.constant 0 : index
    %c0_13 = arith.constant 0 : index
    %10 = vector.load %arg5[%c0_12, %c0_13] : memref<5x32xf32, #tpu.memory_space<vmem>>, vector<5x32xf32>
    %cst_14 = arith.constant dense<0.000000e+00> : vector<8x32xf32>
    %11 = tpu.matmul %9, %10, %cst_14 {dimension_numbers = #tpu.dot_dimension_numbers<[1], [0], [0], [1], [0, 0, 1, 1], [], []>} : vector<8x5xf32>, vector<5x32xf32>, vector<8x32xf32> -> vector<8x32xf32>
    %12 = arith.addf %8, %11 : vector<8x32xf32>
    %c0_15 = arith.constant 0 : index
    %c0_16 = arith.constant 0 : index
    %13 = vector.load %arg19[%c0_15, %c0_16] : memref<8x10xf32, #tpu.memory_space<vmem>>, vector<8x10xf32>
    %c0_17 = arith.constant 0 : index
    %c0_18 = arith.constant 0 : index
    %14 = vector.load %arg6[%c0_17, %c0_18] : memref<10x32xf32, #tpu.memory_space<vmem>>, vector<10x32xf32>
    %cst_19 = arith.constant dense<0.000000e+00> : vector<8x32xf32>
    %15 = tpu.matmul %13, %14, %cst_19 {dimension_numbers = #tpu.dot_dimension_numbers<[1], [0], [0], [1], [0, 0, 1, 1], [], []>} : vector<8x10xf32>, vector<10x32xf32>, vector<8x32xf32> -> vector<8x32xf32>
    %16 = arith.addf %12, %15 : vector<8x32xf32>
    %c0_20 = arith.constant 0 : index
    %c0_21 = arith.constant 0 : index
    %17 = vector.load %arg20[%c0_20, %c0_21] : memref<8x15xf32, #tpu.memory_space<vmem>>, vector<8x15xf32>
    %c0_22 = arith.constant 0 : index
    %c0_23 = arith.constant 0 : index
    %18 = vector.load %arg7[%c0_22, %c0_23] : memref<15x32xf32, #tpu.memory_space<vmem>>, vector<15x32xf32>
    %cst_24 = arith.constant dense<0.000000e+00> : vector<8x32xf32>
    %19 = tpu.matmul %17, %18, %cst_24 {dimension_numbers = #tpu.dot_dimension_numbers<[1], [0], [0], [1], [0, 0, 1, 1], [], []>} : vector<8x15xf32>, vector<15x32xf32>, vector<8x32xf32> -> vector<8x32xf32>
    %20 = arith.addf %16, %19 : vector<8x32xf32>
    %c0_25 = arith.constant 0 : index
    %c0_26 = arith.constant 0 : index
    %21 = vector.load %arg12[%c0_25, %c0_26] : memref<1x32xf32, #tpu.memory_space<vmem>>, vector<1x32xf32>
    %22 = vector.broadcast %21 : vector<1x32xf32> to vector<8x32xf32>
    %23 = arith.addf %20, %22 : vector<8x32xf32>
    %cst_27 = arith.constant 0.000000e+00 : f32
    %24 = vector.broadcast %cst_27 : f32 to vector<8x32xf32>
    %25 = arith.maximumf %23, %24 : vector<8x32xf32>
    %c0_28 = arith.constant 0 : index
    %c0_29 = arith.constant 0 : index
    %26 = vector.load %arg13[%c0_28, %c0_29] : memref<32x32xf32, #tpu.memory_space<vmem>>, vector<32x32xf32>
    %cst_30 = arith.constant dense<0.000000e+00> : vector<8x32xf32>
    %27 = tpu.matmul %25, %26, %cst_30 {dimension_numbers = #tpu.dot_dimension_numbers<[1], [0], [0], [1], [0, 0, 1, 1], [], []>} : vector<8x32xf32>, vector<32x32xf32>, vector<8x32xf32> -> vector<8x32xf32>
    %c0_31 = arith.constant 0 : index
    %c0_32 = arith.constant 0 : index
    %28 = vector.load %arg14[%c0_31, %c0_32] : memref<1x32xf32, #tpu.memory_space<vmem>>, vector<1x32xf32>
    %29 = vector.broadcast %28 : vector<1x32xf32> to vector<8x32xf32>
    %30 = arith.addf %27, %29 : vector<8x32xf32>
    %cst_33 = arith.constant 0.000000e+00 : f32
    %31 = vector.broadcast %cst_33 : f32 to vector<8x32xf32>
    %32 = arith.maximumf %30, %31 : vector<8x32xf32>
    %c0_34 = arith.constant 0 : index
    %c0_35 = arith.constant 0 : index
    %33 = vector.load %arg15[%c0_34, %c0_35] : memref<32x1xf32, #tpu.memory_space<vmem>>, vector<32x1xf32>
    %cst_36 = arith.constant dense<0.000000e+00> : vector<8x1xf32>
    %34 = tpu.matmul %32, %33, %cst_36 {dimension_numbers = #tpu.dot_dimension_numbers<[1], [0], [0], [1], [0, 0, 1, 1], [], []>} : vector<8x32xf32>, vector<32x1xf32>, vector<8x1xf32> -> vector<8x1xf32>
    %c0_37 = arith.constant 0 : index
    %c0_38 = arith.constant 0 : index
    %35 = vector.load %arg16[%c0_37, %c0_38] : memref<1x1xf32, #tpu.memory_space<vmem>>, vector<1x1xf32>
    %36 = vector.broadcast %35 : vector<1x1xf32> to vector<8x1xf32>
    %37 = arith.addf %34, %36 : vector<8x1xf32>
    %c0_39 = arith.constant 0 : index
    %c0_40 = arith.constant 0 : index
    %38 = vector.load %arg17[%c0_39, %c0_40] : memref<8x1xf32, #tpu.memory_space<vmem>>, vector<8x1xf32>
    tpu.vector_store %arg17[%c0_39, %c0_40], %37 {strides = array<i32>} : memref<8x1xf32, #tpu.memory_space<vmem>>, vector<8x1xf32>,
    return
  }
  func.func @transform_0(%arg0: i32, %arg1: memref<24xi32, #tpu.memory_space<smem>>) -> (i32, i32) {
    %c0_i32 = arith.constant 0 : i32
    %c0_i32_0 = arith.constant 0 : i32
    %c0_i32_1 = arith.constant 0 : i32
    return %c0_i32, %c0_i32_0 : i32, i32
  }
  func.func @transform_1(%arg0: i32, %arg1: memref<24xi32, #tpu.memory_space<smem>>) -> (i32, i32) {
    %c0_i32 = arith.constant 0 : i32
    %c0_i32_0 = arith.constant 0 : i32
    %c0_i32_1 = arith.constant 0 : i32
    return %c0_i32, %c0_i32_0 : i32, i32
  }
  func.func @transform_2(%arg0: i32, %arg1: memref<24xi32, #tpu.memory_space<smem>>) -> (i32, i32) {
    %c0_i32 = arith.constant 0 : i32
    %c0_i32_0 = arith.constant 0 : i32
    %c0_i32_1 = arith.constant 0 : i32
    return %c0_i32, %c0_i32_0 : i32, i32
  }
  func.func @transform_3(%arg0: i32, %arg1: memref<24xi32, #tpu.memory_space<smem>>) -> (i32, i32) {
    %c0_i32 = arith.constant 0 : i32
    %c0_i32_0 = arith.constant 0 : i32
    %c0_i32_1 = arith.constant 0 : i32
    return %c0_i32, %c0_i32_0 : i32, i32
  }
  func.func @transform_4(%arg0: i32, %arg1: memref<24xi32, #tpu.memory_space<smem>>) -> (i32, i32) {
    %c0_i32 = arith.constant 0 : i32
    %c0_i32_0 = arith.constant 0 : i32
    %c0_i32_1 = arith.constant 0 : i32
    return %c0_i32, %c0_i32_0 : i32, i32
  }
  func.func @transform_5(%arg0: i32, %arg1: memref<24xi32, #tpu.memory_space<smem>>) -> (i32, i32) {
    %c0_i32 = arith.constant 0 : i32
    %c0_i32_0 = arith.constant 0 : i32
    %c0_i32_1 = arith.constant 0 : i32
    return %c0_i32, %c0_i32_0 : i32, i32
  }
  func.func @transform_6(%arg0: i32, %arg1: memref<24xi32, #tpu.memory_space<smem>>) -> (i32, i32) {
    %c0_i32 = arith.constant 0 : i32
    %c0_i32_0 = arith.constant 0 : i32
    return %arg0, %c0_i32 : i32, i32
  }
  func.func @transform_7(%arg0: i32, %arg1: memref<24xi32, #tpu.memory_space<smem>>) -> (i32, i32) {
    %c0_i32 = arith.constant 0 : i32
    %c0_i32_0 = arith.constant 0 : i32
    %c0_i32_1 = arith.constant 0 : i32
    return %c0_i32, %c0_i32_0 : i32, i32
  }
  func.func @transform_8(%arg0: i32, %arg1: memref<24xi32, #tpu.memory_space<smem>>) -> (i32, i32) {
    %c0_i32 = arith.constant 0 : i32
    %c0_i32_0 = arith.constant 0 : i32
    return %arg0, %c0_i32 : i32, i32
  }
  func.func @transform_9(%arg0: i32, %arg1: memref<24xi32, #tpu.memory_space<smem>>) -> (i32, i32) {
    %c0_i32 = arith.constant 0 : i32
    %c0_i32_0 = arith.constant 0 : i32
    %c0_i32_1 = arith.constant 0 : i32
    return %c0_i32, %c0_i32_0 : i32, i32
  }
  func.func @transform_10(%arg0: i32, %arg1: memref<24xi32, #tpu.memory_space<smem>>) -> (i32, i32) {
    %c0_i32 = arith.constant 0 : i32
    %c0_i32_0 = arith.constant 0 : i32
    %c0_i32_1 = arith.constant 0 : i32
    return %c0_i32, %c0_i32_0 : i32, i32
  }
  func.func @transform_11(%arg0: i32, %arg1: memref<24xi32, #tpu.memory_space<smem>>) -> (i32, i32) {
    %c0_i32 = arith.constant 0 : i32
    %c0_i32_0 = arith.constant 0 : i32
    %c0_i32_1 = arith.constant 0 : i32
    return %c0_i32, %c0_i32_0 : i32, i32
  }
  func.func @transform_12(%arg0: i32, %arg1: memref<24xi32, #tpu.memory_space<smem>>) -> (i32, i32) {
    %c0_i32 = arith.constant 0 : i32
    %c0_i32_0 = arith.constant 0 : i32
    %c0_i32_1 = arith.constant 0 : i32
    return %c0_i32, %c0_i32_0 : i32, i32
  }
  func.func @transform_13(%arg0: i32, %arg1: memref<24xi32, #tpu.memory_space<smem>>) -> (i32, i32) {
    %c0_i32 = arith.constant 0 : i32
    %c0_i32_0 = arith.constant 0 : i32
    %c0_i32_1 = arith.constant 0 : i32
    return %c0_i32, %c0_i32_0 : i32, i32
  }
  func.func @transform_14(%arg0: i32, %arg1: memref<24xi32, #tpu.memory_space<smem>>) -> (i32, i32) {
    %c0_i32 = arith.constant 0 : i32
    %c0_i32_0 = arith.constant 0 : i32
    %c0_i32_1 = arith.constant 0 : i32
    return %c0_i32, %c0_i32_0 : i32, i32
  }
  func.func @transform_15(%arg0: i32, %arg1: memref<24xi32, #tpu.memory_space<smem>>) -> (i32, i32) {
    %c0_i32 = arith.constant 0 : i32
    %c0_i32_0 = arith.constant 0 : i32
    return %arg0, %c0_i32 : i32, i32
  }
}

</mosaic_0001>

<bundles_post_ra>
// kernel: tpu_custom_call.1
= control target key start
LH: loop header
LB: loop body
LE: loop exit
PB: predicated region body
PF: predicated region fallthrough
CT: control target
= control target key end

     0   :  { %s411_s26 = smov [#allocation6]   ;;  %s584_s0 = inlined_call_operand.vmem [shape: s32[24], index: 0, kind: input, shape index: {}]   ;;  %s585_s1 = inlined_call_operand.vmem [shape: f32[10,5], index: 1, kind: input, shape index: {}]   ;;  %s586_s2 = inlined_call_operand.vmem [shape: f32[20,10], index: 2, kind: input, shape index: {}]   ;;  %s587_s3 = inlined_call_operand.vmem [shape: f32[30,15], index: 3, kind: input, shape index: {}]   ;;  %s588_s4 = inlined_call_operand.vmem [shape: f32[5,32], index: 4, kind: input, shape index: {}]   ;;  %s589_s5 = inlined_call_operand.vmem [shape: f32[10,32], index: 5, kind: input, shape index: {}]   ;;  %s590_s6 = inlined_call_operand.vmem [shape: f32[15,32], index: 6, kind: input, shape index: {}]   ;;  %s591_s7 = inlined_call_operand.vmem [shape: f32[8,6], index: 7, kind: input, shape index: {}]   ;;  %s592_s8 = inlined_call_operand.vmem [shape: f32[6,32], index: 8, kind: input, shape index: {}]   ;;  %s593_s9 = inlined_call_operand.vmem [shape: f32[8,3], index: 9, kind: input, shape index: {}]   ;;  %s594_s10 = inlined_call_operand.vmem [shape: f32[3,32], index: 10, kind: input, shape index: {}]   ;;  %s595_s11 = inlined_call_operand.vmem [shape: f32[1,32], index: 11, kind: input, shape index: {}]   ;;  %s596_s12 = inlined_call_operand.vmem [shape: f32[32,32], index: 12, kind: input, shape index: {}]   ;;  %s597_s13 = inlined_call_operand.vmem [shape: f32[1,32], index: 13, kind: input, shape index: {}]   ;;  %s598_s14 = inlined_call_operand.vmem [shape: f32[32,1], index: 14, kind: input, shape index: {}]   ;;  %s599_s16 = inlined_call_operand.vmem [shape: f32[8,1], index: 16, kind: output, shape index: {}]   ;;  %s600_s15 = inlined_call_operand.<no memory space> [shape: f32[1,1], index: 15, kind: input, shape index: {}]  }
   0x1   :  { %602 = sst [smem:[#allocation9_spill]] %s584_s0  ;;  %v26_v0 = vstv %s600_s15 }
   0x2   :  { %603 = sst [smem:[#allocation10_spill]] %s590_s6  ;;  %27 = vst [vmem:[#allocation7] sm:$0x1] %v26_v0 }
   0x3   :  { %s604_s23 = sld [smem:[#allocation9_spill]] }
   0x9   :  { %s22_s6 = sshll.u32 %s604_s23, 4  ;;  %s23_s6 = int_to_ptr.vmem [resolvable:$true] %s22_s6 }
   0xa   :  { %25 = dma.vmem_to_smem %s23_s6, 16, %s411_s26, [#allocation5] }
   0xb   :  { %405 = dma.done.wait [#allocation5], 16 }
   0xc   :  { %406 = vsyncadd [#allocation5], 4294967280 }
   0xd   :  { %30 = sfence }
   0xe   :  { %s503_s27 = smov 0  }
   0xf LB: > { %s69_s28 = smul.u32 3, %s409_s27  ;;  %vm78_vm0 = vcmask 32768   ;;  %vm89_vm1 = vcmask 73728   ;;  %s77_s23 = scalar_lea.vmem [#allocation2], %s409_s27  ;;  %vm100_vm2 = vcmask 114688   ;;  %s409_s27 = sphi %s503_s27, %s67_s27  }
  0x10   : > { %s88_s24 = scalar_lea.vmem [#allocation3], %s409_s27 }
  0x11   : > { %s70_s29 = sld [smem:[#allocation6 + %s69_s28]]  ;;  %s80_s30 = sadd.s32 1, %s69_s28 }
  0x12   : > { %s81_s0 = sld [smem:[#allocation6 + %s80_s30]]  ;;  %s91_s15 = sadd.s32 2, %s69_s28 }
  0x13   : > { %s92_s17 = sld [smem:[#allocation6 + %s91_s15]] }
  0x17   : > { %p71_p0 = scmp.gt.s32.totalorder %s70_s29, 0  ;;  %p344_p1 = scmp.lt.s32.totalorder %s70_s29, 9 }
  0x18   : > { %p82_p2 = scmp.gt.s32.totalorder %s81_s0, 0  ;;  %p349_p3 = scmp.lt.s32.totalorder %s81_s0, 19 }
  0x19   : > { %s607_s29 = smov (!%p71_p0, %s70_s29), 0  ;;  %p93_p4 = scmp.gt.s32.totalorder %s92_s17, 0 }
  0x1a   : > { %s609_s0 = smov (!%p82_p2, %s81_s0), 0  ;;  %s611_s29 = smov (!%p344_p1, %s607_s29), 9 }
  0x1b   : > { %s613_s0 = smov (!%p349_p3, %s609_s0), 19  ;;  %s75_s19 = scalar_lea.vmem %s585_s1, %s611_s29 }
  0x1c   : > { %v76_v1 = vld [vmem:[%s75_s19] sm:$0x1]  ;;  %s86_s22 = scalar_lea.vmem %s586_s2, %s613_s0  ;;  %p354_p5 = scmp.lt.s32.totalorder %s92_s17, 29 }
  0x1d   : > { %79 = vst.msk [vmem:[%s77_s23] sm:$0x1] %vm78_vm0, %v76_v1  ;;  %v87_v2 = vld [vmem:[%s86_s22] sm:$0x1]  ;;  %s615_s17 = smov (!%p93_p4, %s92_s17), 0  ;;  %s99_s29 = scalar_lea.vmem [#allocation4], %s409_s27 }
  0x1e   : > { %90 = vst.msk [vmem:[%s88_s24] sm:$0x1] %vm89_vm1, %v87_v2  ;;  %s617_s17 = smov (!%p354_p5, %s615_s17), 29  ;;  %s67_s27 = sadd.s32 1, %s409_s27  }
  0x1f   : > { %s97_s28 = scalar_lea.vmem %s587_s3, %s617_s17  ;;  %p64_p6 = scmp.ge.s32.totalorder %s67_s27, 8  }
  0x20   : > { %v98_v3 = vld [vmem:[%s97_s28] sm:$0x1]  ;;  %vm168_vm3 = vcmask (%p64_p6), 1044480   ;;  %v195_v5 = vld [vmem:[%s589_s5 + $0x8] sm:$0x3] (%p64_p6)  ;;  %vm200_vm4 = vcmask (%p64_p6), 1041408  }
  0x21   : > { %101 = vst.msk [vmem:[%s99_s29] sm:$0x1] %vm100_vm2, %v98_v3  ;;  %66 = sbr.rel (!%p64_p6) target bundleno = 15 (0xf), region = 93  ;;  %v163_v4 = vld [vmem:[%s588_s4] sm:$0x1f] (%p64_p6)  ;;  %365 = vmatpush.msk.msra.mxu3 (%p64_p6), %vm200_vm4, %v195_v5  ;;  %vm164_vm5 = vcmask (%p64_p6), 39936  }
  0x22   :  { %363 = vmatpush.msk.msra.mxu2 (%p64_p6), %vm168_vm3, %v163_v4  ;;  %v105_v7 = vld [vmem:[%s594_s10] sm:$0x7] (%p64_p6)  ;;  %vm110_vm6 = vcmask (%p64_p6), 1042432   ;;  %vm138_vm7 = vcmask (%p64_p6), 1045504   ;;  %vm106_vm8 = vcmask (%p64_p6), 23552   ;;  %vm134_vm9 = vcmask (%p64_p6), 48128  }
  0x23   :  { %359 = vmatpush.msk.msra.mxu0 (%p64_p6), %vm110_vm6, %v105_v7  ;;  %v103_v8 = vld [vmem:[%s592_s8] sm:$0x3f] (%p64_p6)  ;;  %vm196_vm10 = vcmask (%p64_p6), 80896   ;;  %s605_s22 = sld [smem:[#allocation10_spill]] (%p64_p6)  ;;  %vm232_vm11 = vcmask (%p64_p6), 1046528   ;;  %vm228_vm12 = vcmask (%p64_p6), 121856  }
  0x24   :  { %v162_v6 = vld [vmem:[#allocation2] sm:$0xff] (%p64_p6)  ;;  %361 = vmatpush.msk.msra.mxu1 (%p64_p6), %vm138_vm7, %v103_v8  ;;  %v266_v16 = vld [vmem:[%s596_s12 + $0x18] sm:$0xff] (%p64_p6)  ;;  %v265_v17 = vld [vmem:[%s596_s12 + $0x10] sm:$0xff] (%p64_p6)  ;;  %vm271_vm13 = vcmask (%p64_p6), 261120   ;;  %vm327_vm14 = vcmask (%p64_p6), 7168  }
  0x25   :  { %364 = vmatmul.msk.f32.vlgmr.msra.gmra.mxu2 (%p64_p6), %vm164_vm5, %v162_v6  ;;  %v194_v9 = vld [vmem:[%s589_s5] sm:$0xff] (%p64_p6)  ;;  %v193_v12 = vld [vmem:[#allocation3] sm:$0xff] (%p64_p6)  ;;  %v299_v20 = vld [vmem:[%s598_s14 + $0x18] sm:$0xff] (%p64_p6) }
  0x26   :  { %v104_v10 = vld [vmem:[%s593_s9] sm:$0xff]  ;;  %219 = vmatpush.msra.mxu3 %v194_v9  ;;  %287 = vmatpush.msrb.mxu1 %v266_v16  ;;  %v264_v18 = vld [vmem:[%s596_s12 + $0x8] sm:$0xff]  ;;  %v298_v21 = vld [vmem:[%s598_s14 + $0x10] sm:$0xff] }
  0x27   :  { %v102_v11 = vld [vmem:[%s591_s7] sm:$0xff]  ;;  %360 = vmatmul.msk.f32.vlgmr.msra.gmra.mxu0 %vm106_vm8, %v104_v10  ;;  %366 = vmatmul.msk.f32.vlgmr.msra.gmra.mxu3 %vm196_vm10, %v193_v12  ;;  %v297_v34 = vld [vmem:[%s598_s14 + $0x8] sm:$0xff]  ;;  %v388_v40 = vld [vmem:[#allocation7] ss:$0 sm:$0xff] }
  0x28   :  { %362 = vmatmul.msk.f32.vlgmr.msra.gmra.mxu1 %vm134_vm9, %v102_v11  ;;  %v225_v15 = vld [vmem:[#allocation4] sm:$0xff]  ;;  %v263_v19 = vld [vmem:[%s596_s12] sm:$0xff]  ;;  %319 = vmatpush.msrb.mxu2 %v299_v20 }
  0x29   :  { %v227_v13 = vld [vmem:[%s605_s22 + $0x8] sm:$0x7f]  ;;  %v226_v14 = vld [vmem:[%s605_s22] sm:$0xff]  ;;  %288 = vmatpush.msrb.mxu1 %v265_v17 }
  0x2a   :  { %367 = vmatpush.msk.msrb.mxu0 %vm232_vm11, %v227_v13  ;;  %320 = vmatpush.msrb.mxu2 %v298_v21  ;;  %v386_v30 = vld [vmem:[%s595_s11] ss:$0 sm:$0xff] }
  0x2b   :  { %289 = vmatpush.msrb.mxu1 %v264_v18  ;;  %v296_v35 = vld [vmem:[%s598_s14] sm:$0xff] }
  0x2c   :  { %251 = vmatpush.msrb.mxu0 %v226_v14  ;;  %321 = vmatpush.msrb.mxu2 %v297_v34  ;;  %v387_v36 = vld [vmem:[%s597_s13] ss:$0 sm:$0xff] }
  0x2d   :  { %290 = vmatpush.msrb.mxu1 %v263_v19 }
  0x2e   :  { %322 = vmatpush.msrb.mxu2 %v296_v35 }
  0x2f   :  { %368 = vmatmul.msk.f32.vlgmr.msrb.gmra.mxu0 %vm228_vm12, %v225_v15 }
  0xa4   :  { %v131_v22 = vpop.f32.mrf.mxu0 }
  0xa5   :  { %v159_v23 = vpop.f32.mrf.mxu1 }
  0xa6   :  { %v160_v24 = vadd.f32 %v159_v23, %v131_v22 }
  0xa8   :  { %v189_v25 = vpop.f32.mrf.mxu2 }
  0xa9   :  { %v192_v26 = vadd.f32 %v189_v25, %v160_v24 }
  0xaa   :  { %v221_v27 = vpop.f32.mrf.mxu3 }
  0xab   :  { %v224_v28 = vadd.f32 %v221_v27, %v192_v26 }
  0xac   :  { %v253_v29 = vpop.f32.mrf.mxu0 }
  0xad   :  { %v256_v31 = vadd.f32 %v253_v29, %v224_v28 }
  0xaf   :  { %v261_v32 = vadd.f32 %v386_v30, %v256_v31 }
  0xb1   :  { %v262_v33 = vmax.f32 %v261_v32, 0.0 }
  0xb3   :  { %369 = vmatmul.msk.f32.vlgmr.msrb.gmra.mxu1 %vm271_vm13, %v262_v33 }
 0x130   :  { %v292_v37 = vpop.f32.mrf.mxu1 }
 0x131   :  { %v293_v38 = vadd.f32 %v387_v36, %v292_v37 }
 0x133   :  { %v295_v39 = vmax.f32 %v293_v38, 0.0 }
 0x135   :  { %370 = vmatmul.msk.f32.vlgmr.msrb.gmra.mxu2 %vm271_vm13, %v295_v39 }
 0x1b8   :  { %v324_v41 = vpop.f32.mrf.mxu2 }
 0x1b9   :  { %v325_v42 = vadd.f32 %v388_v40, %v324_v41 }
 0x1bb   :  { %328 = vst.msk [vmem:[%s599_s16] sm:$0xff] %vm327_vm14, %v325_v42 }

</bundles_post_ra>
